<compile_context>
chip_gen: v5e
topology: v5e:2x2
jax: 0.10.0
libtpu: 0.0.40
codegen_flags: <defaults>
</compile_context>

<pallas_src>
import functools

import jax
import jax.numpy as jnp
from jax.experimental import pallas as pl
from jax.experimental.pallas import tpu as pltpu


def _round_up(a, b):
    return ((a + b - 1) // b) * b


def _sublane_pack(dtype):
    # f32 -> 8, bf16/f16 -> 16, int8/fp8 -> 32
    itemsize = jnp.dtype(dtype).itemsize
    return max(8, 32 // itemsize)


def _rmsnorm_kernel(x_ref, w_ref, o_ref, *, eps, inv_c, exact_cast):
    # x_ref: (tm, C) row tile (original dtype); w_ref: (1, C) weight.
    x = x_ref[...].astype(jnp.float32)                       # x.float()
    ms = jnp.sum(x * x, axis=-1, keepdims=True) * inv_c      # mean over C
    normed = x * jax.lax.rsqrt(ms + eps)                     # _norm (EUP rsqrt)
    if exact_cast:
        # PyTorch rounding: _norm(x.float()).type_as(x) * weight
        y = normed.astype(x_ref.dtype)
        o_ref[...] = (y * w_ref[...]).astype(o_ref.dtype)
    else:
        # Fast path: stay in f32 and cast once (saves two full-tile VPU casts
        # and one f32 temp).  Slight rounding deviation from PyTorch.
        o_ref[...] = (normed * w_ref[...].astype(jnp.float32)).astype(o_ref.dtype)


def _choose_row_tile(rows, c, in_dtype, out_dtype, budget_bytes, target_tile_bytes):
    """Row tile: byte-targeted, VMEM-budgeted, and >= ~16 grid steps."""
    pack = _sublane_pack(in_dtype)
    in_b = jnp.dtype(in_dtype).itemsize
    out_b = jnp.dtype(out_dtype).itemsize
    # 2x (input + output) tiles for double buffering plus ~4 full-tile f32
    # temps (x_f32, x*x, normed, product) that Mosaic may materialize.
    bytes_per_row = c * (2 * in_b + 2 * out_b + 4 * 4)
    tm_budget = max(1, budget_bytes // bytes_per_row)
    # ~2-4 MiB input tiles already reach ~85%+ of HBM roofline; bigger only
    # hurts pipelining / VMEM headroom.
    tm_bytes = max(1, target_tile_bytes // (c * in_b))
    # Keep the grid at >= ~16 total steps (>= 8 per TensorCore on v7x
    # megacore) so pipeline prologue/epilogue DMAs stay hidden.
    tm_steps = _round_up(pl.cdiv(rows, 16), pack)
    tm = min(tm_budget, tm_bytes, tm_steps)
    tm = (tm // pack) * pack
    return max(pack, tm)


def _default_vmem_limit_bytes():
    # ~half the per-core VMEM: ~32 MiB on v7x (64 MiB/TC), ~64 MiB on v5e/v6e.
    try:
        cap = int(pltpu.get_tpu_info().vmem_capacity_bytes)
    except Exception:
        cap = 64 * 1024 * 1024  # conservative fallback (v7x per-TC size)
    return min(cap // 2, 64 * 1024 * 1024)


def wan_rms_norm(x, weight, eps=1e-5, *,
                 out_dtype=None,
                 cast_weight_to_x_dtype=False,
                 exact_cast=True,
                 vmem_budget_bytes=12 * 1024 * 1024,
                 target_tile_bytes=4 * 1024 * 1024,
                 input_buffer_count=2):
    """x: [B, L, C]; weight: [C]. Returns [B, L, C].

    Defaults reproduce PyTorch semantics exactly (f32 accumulation, .type_as(x)
    rounding, strict dtype promotion for the output).  For bf16 activations,
    pass out_dtype=x.dtype (or cast_weight_to_x_dtype=True) to halve HBM
    writeback, and exact_cast=False to skip the bf16 round-trip inside the
    kernel; both are opt-in since they deviate slightly from PyTorch rounding.
    """
    B, L, C = x.shape
    assert weight.shape == (C,)

    if cast_weight_to_x_dtype:
        weight = weight.astype(x.dtype)
    if out_dtype is None:
        out_dtype = jnp.promote_types(x.dtype, weight.dtype)  # PyTorch promotion

    rows = B * L
    tm = _choose_row_tile(rows, C, x.dtype, out_dtype,
                          vmem_budget_bytes, target_tile_bytes)

    x2d = x.reshape(rows, C)          # free view, no HBM pass
    w2d = weight.reshape(1, C)

    kernel = functools.partial(_rmsnorm_kernel, eps=eps, inv_c=1.0 / C,
                               exact_cast=exact_cast)

    # Full-C blocks (block last dim == array dim, valid for any C); partial
    # last row block is handled by Pallas OOB-store masking.
    if input_buffer_count != 2:
        x_spec = pl.BlockSpec((tm, C), lambda i: (i, 0),
                              pipeline_mode=pl.Buffered(input_buffer_count))
    else:
        x_spec = pl.BlockSpec((tm, C), lambda i: (i, 0))

    out2d = pl.pallas_call(
        kernel,
        out_shape=jax.ShapeDtypeStruct((rows, C), out_dtype),
        grid_spec=pltpu.PrefetchScalarGridSpec(
            num_scalar_prefetch=0,
            grid=(pl.cdiv(rows, tm),),
            in_specs=[
                x_spec,                                       # input row tile
                pl.BlockSpec((1, C), lambda i: (0, 0)),       # weight (reused)
            ],
            out_specs=pl.BlockSpec((tm, C), lambda i: (i, 0)),
        ),
        compiler_params=pltpu.CompilerParams(
            dimension_semantics=("parallel",),                # megacore rows
            vmem_limit_bytes=_default_vmem_limit_bytes(),
        ),
    )(x2d, w2d)

    return out2d.reshape(B, L, C)


def wan_rms_norm_ref(x, weight, eps=1e-5):
    xf = x.astype(jnp.float32)
    ms = jnp.mean(xf * xf, axis=-1, keepdims=True)
    normed = (xf * jax.lax.rsqrt(ms + eps)).astype(x.dtype)
    return normed * weight


if __name__ == "__main__":
    eps = 1e-5
    key = jax.random.PRNGKey(0)
    k1, k2 = jax.random.split(key)

    # Case 1: small f32, C not a multiple of 128 (full-C block, masked stores),
    # rows not a multiple of the chosen tile (partial last row block).
    B, L, C = 2, 8, 32
    x = jax.random.normal(k1, (B, L, C), dtype=jnp.float32)
    weight = jnp.ones((C,), dtype=jnp.float32)   # nn.Parameter(torch.ones(dim))

    out = jax.block_until_ready(wan_rms_norm(x, weight, eps=eps))
    ref = wan_rms_norm_ref(x, weight, eps=eps)
    assert out.shape == x.shape and out.dtype == ref.dtype
    assert jnp.allclose(out, ref, atol=1e-5, rtol=1e-5), "f32 mismatch vs reference"

    # Case 2: bf16 activations, f32 weight, rows=18 (partial last block),
    # strict PyTorch promotion (f32 output).
    B2, L2, C2 = 2, 9, 256
    xb = jax.random.normal(k2, (B2, L2, C2), dtype=jnp.bfloat16)
    wb = (1.0 + 0.1 * jax.random.normal(jax.random.PRNGKey(1), (C2,))).astype(jnp.float32)
    outb = jax.block_until_ready(wan_rms_norm(xb, wb, eps=eps))
    refb = wan_rms_norm_ref(xb, wb, eps=eps)
    assert outb.shape == xb.shape and outb.dtype == refb.dtype
    assert jnp.allclose(outb, refb, atol=2e-2, rtol=2e-2), "bf16 mismatch vs reference"

    # Case 3: bf16 fast path (bf16 writeback + single f32 multiply/cast).
    outf = jax.block_until_ready(
        wan_rms_norm(xb, wb, eps=eps, out_dtype=xb.dtype, exact_cast=False))
    assert outf.shape == xb.shape and outf.dtype == xb.dtype
    assert jnp.allclose(outf.astype(jnp.float32), refb.astype(jnp.float32),
                        atol=3e-2, rtol=3e-2), "bf16 fast-path mismatch vs reference"

    print("KERNEL_OK")
</pallas_src>

<mosaic_0001>
module attributes {stable_mosaic.version = 11 : i64} {
  func.func @_rmsnorm_kernel(%arg0: i32, %arg1: memref<8x32xf32, #tpu.memory_space<vmem>>, %arg2: memref<1x32xf32, #tpu.memory_space<vmem>>, %arg3: memref<8x32xf32, #tpu.memory_space<vmem>>) attributes {dimension_semantics = [#tpu.dimension_semantics<parallel>], iteration_bounds = array<i64: 2>, scalar_prefetch = 0 : i64, scratch_operands = 0 : i64, tpu.core_type = #tpu.core_type<tc>, window_params = [{transform_indices = @transform_0, window_bounds = array<i64: 8, 32>}, {pipeline_mode = #tpu.pipeline_mode<synchronous>, transform_indices = @transform_1, window_bounds = array<i64: 1, 32>}, {transform_indices = @transform_2, window_bounds = array<i64: 8, 32>}]} {
    %c0 = arith.constant 0 : index
    %c0_0 = arith.constant 0 : index
    %0 = vector.load %arg1[%c0, %c0_0] : memref<8x32xf32, #tpu.memory_space<vmem>>, vector<8x32xf32>
    %1 = arith.mulf %0, %0 : vector<8x32xf32>
    %cst = arith.constant dense<0.000000e+00> : vector<8xf32>
    %2 = vector.multi_reduction <add>, %1, %cst [1] : vector<8x32xf32> to vector<8xf32>
    %3 = vector.shape_cast %2 : vector<8xf32> to vector<8x1xf32>
    %cst_1 = arith.constant 3.125000e-02 : f32
    %4 = vector.broadcast %cst_1 : f32 to vector<8x1xf32>
    %5 = arith.mulf %3, %4 : vector<8x1xf32>
    %cst_2 = arith.constant 9.99999974E-6 : f32
    %6 = vector.broadcast %cst_2 : f32 to vector<8x1xf32>
    %7 = arith.addf %5, %6 : vector<8x1xf32>
    %8 = math.rsqrt %7 : vector<8x1xf32>
    %9 = vector.broadcast %8 : vector<8x1xf32> to vector<8x32xf32>
    %10 = arith.mulf %0, %9 : vector<8x32xf32>
    %c0_3 = arith.constant 0 : index
    %c0_4 = arith.constant 0 : index
    %11 = vector.load %arg2[%c0_3, %c0_4] : memref<1x32xf32, #tpu.memory_space<vmem>>, vector<1x32xf32>
    %12 = vector.broadcast %11 : vector<1x32xf32> to vector<8x32xf32>
    %13 = arith.mulf %10, %12 : vector<8x32xf32>
    %c0_5 = arith.constant 0 : index
    %c0_6 = arith.constant 0 : index
    %14 = vector.load %arg3[%c0_5, %c0_6] : memref<8x32xf32, #tpu.memory_space<vmem>>, vector<8x32xf32>
    tpu.vector_store %arg3[%c0_5, %c0_6], %13 {strides = array<i32>} : memref<8x32xf32, #tpu.memory_space<vmem>>, vector<8x32xf32>,
    return
  }
  func.func @transform_0(%arg0: i32) -> (i32, i32) {
    %c0_i32 = arith.constant 0 : i32
    %c0_i32_0 = arith.constant 0 : i32
    return %arg0, %c0_i32 : i32, i32
  }
  func.func @transform_1(%arg0: i32) -> (i32, i32) {
    %c0_i32 = arith.constant 0 : i32
    %c0_i32_0 = arith.constant 0 : i32
    %c0_i32_1 = arith.constant 0 : i32
    return %c0_i32, %c0_i32_0 : i32, i32
  }
  func.func @transform_2(%arg0: i32) -> (i32, i32) {
    %c0_i32 = arith.constant 0 : i32
    %c0_i32_0 = arith.constant 0 : i32
    return %arg0, %c0_i32 : i32, i32
  }
}

</mosaic_0001>

<bundles_post_ra>
// kernel: tpu_custom_call.1
= control target key start
LH: loop header
LB: loop body
LE: loop exit
PB: predicated region body
PF: predicated region fallthrough
CT: control target
= control target key end

     0   :  { %7 = vsyncpa [#allocation3], 0  ;;  %s659_s0 = inlined_call_operand.hbm [shape: f32[16,32], index: 0, kind: input, shape index: {}]   ;;  %s660_s1 = inlined_call_operand.hbm [shape: f32[1,32], index: 1, kind: input, shape index: {}]   ;;  %s661_s2 = inlined_call_operand.hbm [shape: f32[16,32], index: 2, kind: output, shape index: {}]  }
   0x1   :  { %9 = vsyncpa [#allocation3 + $0x1], 0 }
   0x2   :  { %10 = vsyncpa [#allocation6], 0 }
   0x3   :  { %11 = vsyncpa [#allocation4], 0 }
   0x4   :  { %13 = vsyncpa [#allocation4 + $0x1], 0  ;;  %s519_s9 = smov 0   ;;  %s521_s10 = smov 0  }
   0x5   :  { %s523_s11 = smov 0   ;;  %s525_s12 = smov 0  }
   0x6 LB: > { %s540_s13 = sadd.s32 4294967295, %s501_s12   ;;  %s297_s14 = sadd.s32 4294967294, %s501_s12   ;;  %s501_s12 = sphi %s525_s12, %s671_s12   ;;  %s497_s11 = sphi %s523_s11, %s670_s11   ;;  %s493_s10 = sphi %s521_s10, %s669_s10   ;;  %s489_s9 = sphi %s519_s9, %s668_s9  }
   0x7   : > { %p39_p0 = scmp.ne.s32.totalorder %s493_s10, %s489_s9  ;;  %p40_p1 = scmp.eq.s32.totalorder %s540_s13, 0 }
   0x8   : > { %p84_p2 = scmp.eq.s32.totalorder %s540_s13, 1  ;;  %p90_p3 = scmp.eq.s32.totalorder %s297_s14, 1 }
   0x9   : > { %p549_p4 = por %p40_p1, %p39_p0  ;;  %p298_p5 = scmp.ge.s32.totalorder %s501_s12, 1 }
   0xa   : > { %p554_p6 = por %p90_p3, %p39_p0  ;;  %p97_p7 = scmp.lt.s32.totalorder %s501_s12, 3 }
   0xb   : > { %s109_s19 = sshll.u32 %s660_s1, 4  ;;  %s503_s21 = smov [#allocation5]   ;;  %s110_s19 = int_to_ptr.hbm [resolvable:$true] %s109_s19 }
   0xc   : > { %p562_p8 = pnand %p298_p5, %p97_p7  ;;  %s111_s22 = sshll.u32 %s503_s21, 4  ;;  %s112_s22 = int_to_ptr.vmem [resolvable:$true] %s111_s22 }
   0xd   : > { %s572_s23 = sadd.s32 1, %s501_s12   ;;  %s26_s24 = sadd.s32 1, %s497_s11 }
   0xe   : > { %p319_p10 = pneg %p562_p8  ;;  %s23_s25 = ssub.s32 %s501_s12, %s572_s23 }
   0xf   : > { %p24_p12 = scmp.eq.s32.totalorder %s23_s25, 0  ;;  %p33_p13 = scmp.ne.s32.totalorder %s497_s11, %s493_s10 }
  0x10   : > { %p320_p11 = pnand %p319_p10, %p40_p1  ;;  %p34_p0 = scmp.eq.s32.totalorder %s501_s12, 0 }
  0x11   : > { %s581_s26 = scalar_select %p24_p12, %s497_s11, %s26_s24  }
  0x12   : > { %322 = dma.hbm_to_vmem [thread:$0]  (!%p320_p11), %s110_s19, 16, %s112_s22, [#allocation6]  }
  0x13   : > { %p585_p3 = por %p84_p2, %p33_p13  ;;  %p332_p5 = scmp.lt.s32.totalorder %s501_s12, 2 }
  0x14   : > { %s122_s28 = sand.u32 1, %s497_s11   ;;  %s302_s29 = sshll.u32 %s501_s12, 3 }
  0x15   : > { %p35_p7 = por %p34_p0, %p33_p13  ;;  %s301_s30 = sshll.u32 %s122_s28, 3 }
  0x16   : > { %s130_s5 = scalar_lea.hbm %s659_s0, %s302_s29  ;;  %s126_s7 = scalar_lea.vmem [#allocation2], %s301_s30 }
  0x17   : > { %s132_s6 = sshll.u32 %s130_s5, 4  ;;  %s134_s8 = sshll.u32 %s126_s7, 4  ;;  %s133_s6 = int_to_ptr.hbm [resolvable:$true] %s132_s6  ;;  %s135_s8 = int_to_ptr.vmem [resolvable:$true] %s134_s8 }
  0x18   : > { %p595_p10 = pnand %p332_p5, %p35_p7  ;;  %s123_s17 = scalar_lea.sflag [#allocation3], %s122_s28 }
  0x19   : > { %s401_s18 = sshra.s32 %s133_s6, 4  ;;  %s408_s24 = scalar_lea.hbm %s659_s0, 16  ;;  %s402_s18 = int_to_ptr.hbm [resolvable:$true] %s401_s18 }
  0x1a   : > { %s403_s19 = scalar_lea.hbm %s402_s18, 8  ;;  %p405_p11 = pneg %p595_p10 }
  0x1b   : > { %p404_p2 = scmp.ne.s32.totalorder %s402_s18, %s403_s19  ;;  %p409_p0 = scmp.lt.s32.totalorder %s402_s18, %s659_s0 }
  0x1c   : > { %p410_p5 = scmp.lt.s32.totalorder %s408_s24, %s403_s19 }
  0x1d   : > { %p406_p12 = pnand %p405_p11, %p404_p2 }
  0x1e   : > { %p411_p7 = por %p410_p5, %p409_p0 }
  0x1f   : > { %p407_p13 = pneg %p406_p12 }
  0x21   : > { %p412_p9 = pnand %p411_p7, %p407_p13 }
  0x23   : > { %415 = shalt.err (!%p412_p9)
}
  0x24   : > { %326 = dma.hbm_to_vmem [thread:$0]  (!%p595_p10), %s133_s6, 128, %s135_s8, %s123_s17  }
  0x25   : > { %143 = sbr.rel (%p562_p8) target bundleno = 194 (0xc2), region = 28  ;;  %s612_s28 = sand.u32 (!%p562_p8), 1, %s493_s10  }
  0x26   : > { %s304_s30 = sshll.u32 (!%p562_p8), %s612_s28, 3  ;;  %s146_s3 = scalar_lea.sflag (!%p562_p8), [#allocation3], %s612_s28 }
  0x27   : > { %s149_s4 = scalar_lea.vmem (!%p562_p8), [#allocation2], %s304_s30 }
  0x2a   : > { %476 = dma.done.wait (%p549_p4), %s146_s3, 128  }
  0x2b   : > { %478 = vsyncadd (%p549_p4), %s146_s3, 4294967168 }
  0x2c   : > { %480 = dma.done.wait (%p40_p1), [#allocation6], 16  }
  0x2d   : > { %482 = vsyncadd (%p40_p1), [#allocation6], 4294967280  ;;  %v176_v0 = vld [vmem:[%s149_s4] sm:$0xff]  ;;  %vm178_vm0 = vcmask 261120   ;;  %s308_s15 = sshll.u32 %s540_s13, 3  ;;  %s175_s7 = scalar_lea.vmem [#allocation7], %s304_s30 }
  0x2e   : > { %v177_v1 = vmul.f32 %v176_v0, %v176_v0  ;;  %s212_s6 = scalar_lea.hbm %s661_s2, %s308_s15  ;;  %v368_v12 = vld [vmem:[#allocation5] ss:$0 sm:$0xff]  ;;  %s214_s8 = sshll.u32 %s175_s7, 4  ;;  %s215_s8 = int_to_ptr.vmem [resolvable:$true] %s214_s8 }
  0x2f   : > { %s216_s14 = sshll.u32 %s212_s6, 4  ;;  %s202_s13 = scalar_lea.sflag [#allocation4], %s612_s28  ;;  %s217_s14 = int_to_ptr.hbm [resolvable:$true] %s216_s14 }
  0x30   : > { %v179_v2 = vsel %vm178_vm0, %v177_v1, 0.0  ;;  %s445_s17 = sshra.s32 %s217_s14, 4  ;;  %s451_s22 = scalar_lea.hbm %s661_s2, 16  ;;  %s446_s17 = int_to_ptr.hbm [resolvable:$true] %s445_s17 }
  0x31   : > { %180 = vadd.xlane.f32.xlu0 %v179_v2  ;;  %s447_s18 = scalar_lea.hbm %s446_s17, 8  ;;  %p452_p9 = scmp.lt.s32.totalorder %s446_s17, %s661_s2 }
  0x32   : > { %p448_p1 = scmp.ne.s32.totalorder %s446_s17, %s447_s18  ;;  %p453_p10 = scmp.lt.s32.totalorder %s451_s22, %s447_s18 }
  0x34   : > { %p449_p4 = pnand %p448_p1, %p585_p3  ;;  %p454_p2 = por %p453_p10, %p452_p9 }
  0x36   : > { %p450_p8 = pneg %p449_p4 }
  0x38   : > { %p455_p11 = pnand %p454_p2, %p450_p8 }
  0xa4   : > { %v181_v3 = vpop.xlane.xlu0 %180 }
  0xa5   : > { %v182_v4 = vmul.f32 0.03125, %v181_v3 }
  0xa7   : > { %v183_v5 = vadd.f32 1e-05, %v182_v4 }
  0xa9   : > { %369 = vrsqrt.f32 %v183_v5  ;;  %vm190_vm2 = vweird.f32 %v183_v5 }
  0xaf   : > { %v370_v6 = vpop.eup %369 }
  0xb0   : > { %v185_v7 = vmul.f32 %v370_v6, %v183_v5  ;;  %vm191_vm1 = vweird.f32 %v370_v6 }
  0xb1   : > { %vm192_vm3 = vmor %vm190_vm2, %vm191_vm1 }
  0xb2   : > { %v186_v8 = vmul.f32 %v370_v6, %v185_v7 }
  0xb4   : > { %v187_v9 = vmul.f32 0.5, %v186_v8 }
  0xb6   : > { %v188_v10 = vsub.f32 1.5, %v187_v9 }
  0xb8   : > { %v189_v11 = vmul.f32 %v370_v6, %v188_v10 }
  0xba   : > { %v193_v13 = vsel %vm192_vm3, %v370_v6, %v189_v11 }
  0xbb   : > { %v194_v14 = vmul.f32 %v193_v13, %v176_v0 }
  0xbd   : > { %v199_v15 = vmul.f32 %v368_v12, %v194_v14 }
  0xbf   : > { %200 = vst.msk [vmem:[%s175_s7] sm:$0xff] %vm178_vm0, %v199_v15 }
  0xc0   : > { %458 = shalt.err (!%p455_p11)
}
  0xc1   : > { %317 = dma.vmem_to_hbm [thread:$0]  (%p585_p3), %s215_s8, 128, %s217_s14, %s202_s13  }
  0xc2 PF: > { %s228_s29 = sand.u32 1, %s489_s9   ;;  %p667_p12 = scmp.ge.s32.totalorder %s501_s12, 2 }
  0xc3   : > { %s229_s28 = scalar_lea.sflag [#allocation4], %s228_s29 }
  0xc4   : > { %p328_p13 = pnand %p667_p12, %p554_p6 }
  0xc6   : > { %p329_p0 = pneg %p328_p13 }
  0xc8   : > { %484 = dma.done.wait (%p329_p0), %s229_s28, 128  }
  0xc9   : > { %486 = vsyncadd (%p329_p0), %s229_s28, 4294967168  ;;  %p16_p5 = scmp.ge.s32.totalorder %s572_s23, 4   ;;  %s668_s9 = smov %s493_s10 }
  0xca   : > { %s669_s10 = smov %s497_s11  ;;  %s670_s11 = smov %s581_s26 }
  0xcb   : > { %s671_s12 = smov %s572_s23  ;;  %18 = sbr.rel (!%p16_p5) target bundleno = 6 (0x6), region = 77 }
  0xd0   :  { %235 = vsyncpa [#allocation3], 1 }
  0xd1   :  { %237 = vsyncpa [#allocation3 + $0x1], 1 }
  0xd2   :  { %238 = vsyncpa [#allocation6], 1 }
  0xd3   :  { %239 = vsyncpa [#allocation4], 1 }
  0xd4   :  { %241 = vsyncpa [#allocation4 + $0x1], 1 }

</bundles_post_ra>
